<compile_context>
chip_gen: v7x
topology: tpu7x:2x2x1
jax: 0.10.0
libtpu: 0.0.40
codegen_flags: <defaults>
</compile_context>

<pallas_src>
import jax
import jax.numpy as jnp
import numpy as np
from jax.experimental import pallas as pl
from jax.experimental import pallas as _pl_unused  # noqa: F401
from jax.experimental.pallas import tpu as pltpu  # noqa: F401  (not needed: no manual DMA/scratch)


# ----------------------------------------------------------------------------
# Fused wavefront kernel: all LSTM layers + final Linear, one invocation.
# ----------------------------------------------------------------------------
def make_wavefront_lstm_kernel(num_layers, seq_len, batch, hidden):
    L, S, B, H = num_layers, seq_len, batch, hidden
    LH = L * H
    W4 = 4 * LH

    def kernel(x_ref, wih0_ref, bias_ref, wblk_ref, wfc_ref, bfc_ref, out_ref):
        # ---- hoisted, off the serial critical path --------------------------
        # Lane constants for the single-tanh activation:
        #   sigmoid lanes (i,f,o): 0.5*tanh(0.5*x) + 0.5
        #   tanh    lanes (g)    : 1.0*tanh(1.0*x) + 0.0
        lane = jax.lax.broadcasted_iota(jnp.int32, (B, W4), 1)
        is_g = (lane >= 2 * LH) & (lane < 3 * LH)
        scl = jnp.where(is_g, 1.0, 0.5).astype(jnp.float32)
        off = jnp.where(is_g, 0.0, 0.5).astype(jnp.float32)
        lane_h = jax.lax.broadcasted_iota(jnp.int32, (B, LH), 1)

        bias_full = bias_ref[...]                                  # (1, W4)
        # Layer-0 input projection + fused biases of every layer, for ALL
        # timesteps at once (rows time-major: row t*B + b). One matmul, not
        # on the recurrent chain.
        gx = jnp.dot(x_ref[...], wih0_ref[...],
                     preferred_element_type=jnp.float32) + bias_full  # (S*B, W4)
        wblk = wblk_ref[...]                                       # (LH, W4)

        h_all = jnp.zeros((B, LH), jnp.float32)    # packed [h_0 | ... | h_{L-1}]
        c_all = jnp.zeros((B, LH), jnp.float32)

        # ---- wavefront recurrence: S + L - 1 serial steps --------------------
        for d in range(S + L - 1):
            gate_add = gx[d * B:(d + 1) * B, :] if d < S else bias_full
            if d == 0:
                gates = gate_add              # h_all == 0 -> recurrent term is 0
            else:
                # ONE fused block matmul feeds every active layer's gates
                # (dot result consumed by a single add -> MRB-friendly on v7x).
                gates = jnp.dot(h_all, wblk,
                                preferred_element_type=jnp.float32) + gate_add

            act = jnp.tanh(gates * scl) * scl + off       # one EUP sweep, 4LH wide
            i_a = act[:, 0 * LH:1 * LH]
            f_a = act[:, 1 * LH:2 * LH]
            g_a = act[:, 2 * LH:3 * LH]
            o_a = act[:, 3 * LH:4 * LH]

            c_new = f_a * c_all + i_a * g_a
            h_new = o_a * jnp.tanh(c_new)                 # one tanh(c) for all layers

            lo = max(0, d - S + 1)       # first active layer at this diagonal
            hi = min(d, L - 1)           # last active layer at this diagonal
            if lo == 0 and hi == L - 1:  # steady state: every layer active
                c_all, h_all = c_new, h_new
            else:                        # boundary step: freeze idle layers
                m = (lane_h >= lo * H) & (lane_h < (hi + 1) * H)
                c_all = jnp.where(m, c_new, c_all)
                h_all = jnp.where(m, h_new, h_all)

        # ---- Linear(hidden -> seq_length) on last timestep of top layer -----
        h_top = h_all[:, (L - 1) * H:L * H]
        out_ref[...] = (jnp.dot(h_top, wfc_ref[...],
                                preferred_element_type=jnp.float32)
                        + bfc_ref[...])

    return kernel


# ----------------------------------------------------------------------------
# Parameter packing (one-time, numpy, outside jit)
# ----------------------------------------------------------------------------
def pack_wavefront_params(layer_params, input_size, hidden_size):
    """layer_params: list of PyTorch-layout (w_ih (4H,in), w_hh (4H,H), b_ih, b_hh),
    gate order [i, f, g, o].

    Returns:
      w_ih0p    (I, 4LH)  : layer-0 input weights (zero in other layers' lanes)
      bias_full (1, 4LH)  : fused b_ih + b_hh of every layer
      w_block   (LH, 4LH) : [[W_hh1, W_ih2],[0, W_hh2]] generalized to L layers
    Columns are gate-major across layers: [ i(LH) | f(LH) | g(LH) | o(LH) ],
    layer l occupying lanes [l*H,(l+1)*H) inside each gate block, matching the
    packed (B, L*H) h/c carries in the kernel.
    """
    L, H, I = len(layer_params), hidden_size, input_size
    LH = L * H
    w_ih0p = np.zeros((I, 4 * LH), np.float32)
    bias_full = np.zeros((1, 4 * LH), np.float32)
    w_block = np.zeros((LH, 4 * LH), np.float32)
    for l, (w_ih, w_hh, b_ih, b_hh) in enumerate(layer_params):
        w_ih = np.asarray(w_ih, np.float32)
        w_hh = np.asarray(w_hh, np.float32)
        b = np.asarray(b_ih, np.float32) + np.asarray(b_hh, np.float32)
        for g in range(4):
            cols = slice(g * LH + l * H, g * LH + (l + 1) * H)
            rows = slice(g * H, (g + 1) * H)
            bias_full[0, cols] = b[rows]
            w_block[l * H:(l + 1) * H, cols] = w_hh[rows, :].T
            if l == 0:
                w_ih0p[:, cols] = w_ih[rows, :].T
            else:
                # layer l's input is h_{l-1} -> its W_ih rides in the block matmul
                w_block[(l - 1) * H:l * H, cols] = w_ih[rows, :].T
    return jnp.asarray(w_ih0p), jnp.asarray(bias_full), jnp.asarray(w_block)


# ----------------------------------------------------------------------------
# Wrapper
# ----------------------------------------------------------------------------
@jax.jit
def lstm1_forward(x, w_ih0p, bias_full, w_block, w_fc_t, b_fc):
    """LSTM1.forward: x (B, S, I) batch-first -> (B, seq_length)."""
    B, S, I = x.shape
    H = w_fc_t.shape[0]
    LH = w_block.shape[0]
    L = LH // H
    out_dim = w_fc_t.shape[1]

    # Time-major flatten of the tiny input (S*B*I floats); single cheap XLA op
    # feeding the kernel's hoisted input projection.
    x2d = jnp.transpose(x, (1, 0, 2)).reshape(S * B, I)

    kernel = make_wavefront_lstm_kernel(L, S, B, H)
    return pl.pallas_call(
        kernel,
        out_shape=jax.ShapeDtypeStruct((B, out_dim), jnp.float32),
    )(x2d, w_ih0p, bias_full, w_block, w_fc_t, b_fc)


# ----------------------------------------------------------------------------
# Pure-JAX reference (faithful to nn.LSTM + Linear, for correctness check)
# ----------------------------------------------------------------------------
def ref_forward(x, layer_params, w_fc, b_fc):
    x_seq = jnp.transpose(x, (1, 0, 2))                     # (S, B, I)
    for (w_ih, w_hh, b_ih, b_hh) in layer_params:
        H = w_hh.shape[1]
        B = x_seq.shape[1]

        def step(carry, x_t):
            h, c = carry
            gates = x_t @ w_ih.T + h @ w_hh.T + b_ih + b_hh
            i = jax.nn.sigmoid(gates[:, 0 * H:1 * H])
            f = jax.nn.sigmoid(gates[:, 1 * H:2 * H])
            g = jnp.tanh(gates[:, 2 * H:3 * H])
            o = jax.nn.sigmoid(gates[:, 3 * H:4 * H])
            c = f * c + i * g
            h = o * jnp.tanh(c)
            return (h, c), h

        init = (jnp.zeros((B, H), jnp.float32), jnp.zeros((B, H), jnp.float32))
        _, x_seq = jax.lax.scan(step, init, x_seq)
    return x_seq[-1] @ w_fc.T + b_fc


# ----------------------------------------------------------------------------
# Main
# ----------------------------------------------------------------------------
if __name__ == "__main__":
    # Module hyperparameters (small, consistent with LSTM1.forward)
    num_classes = 10        # unused in forward (matches the PyTorch module)
    input_size = 4
    hidden_size = 32
    num_layers = 2
    seq_length = 8
    batch = 2

    key = jax.random.PRNGKey(0)
    key, k_x = jax.random.split(key)
    x = jax.random.normal(k_x, (batch, seq_length, input_size), jnp.float32)

    # PyTorch-style uniform(-1/sqrt(H), 1/sqrt(H)) init, PyTorch weight layout.
    bound = 1.0 / np.sqrt(hidden_size)
    layer_params = []
    in_dim = input_size
    for _ in range(num_layers):
        key, k1, k2, k3, k4 = jax.random.split(key, 5)
        w_ih = jax.random.uniform(k1, (4 * hidden_size, in_dim), jnp.float32, -bound, bound)
        w_hh = jax.random.uniform(k2, (4 * hidden_size, hidden_size), jnp.float32, -bound, bound)
        b_ih = jax.random.uniform(k3, (4 * hidden_size,), jnp.float32, -bound, bound)
        b_hh = jax.random.uniform(k4, (4 * hidden_size,), jnp.float32, -bound, bound)
        layer_params.append((w_ih, w_hh, b_ih, b_hh))
        in_dim = hidden_size

    key, k5, k6 = jax.random.split(key, 3)
    w_fc = jax.random.uniform(k5, (seq_length, hidden_size), jnp.float32, -bound, bound)
    b_fc = jax.random.uniform(k6, (seq_length,), jnp.float32, -bound, bound)

    # Pack weights for the wavefront kernel (one-time, outside jit).
    w_ih0p, bias_full, w_block = pack_wavefront_params(layer_params, input_size, hidden_size)
    w_fc_t = jnp.asarray(w_fc).T
    b_fc2d = jnp.asarray(b_fc)[None, :]

    out = lstm1_forward(x, w_ih0p, bias_full, w_block, w_fc_t, b_fc2d)
    out = jax.block_until_ready(out)

    ref = ref_forward(x, layer_params, w_fc, b_fc)
    np.testing.assert_allclose(np.asarray(out), np.asarray(ref),
                               rtol=1e-5, atol=1e-5)
    assert out.shape == (batch, seq_length)

    print("KERNEL_OK")
</pallas_src>

<mosaic_0001>
module attributes {stable_mosaic.version = 11 : i64} {
  func.func @kernel(%arg0: memref<16x4xf32, #tpu.memory_space<vmem>>, %arg1: memref<4x256xf32, #tpu.memory_space<vmem>>, %arg2: memref<1x256xf32, #tpu.memory_space<vmem>>, %arg3: memref<64x256xf32, #tpu.memory_space<vmem>>, %arg4: memref<32x8xf32, #tpu.memory_space<vmem>>, %arg5: memref<1x8xf32, #tpu.memory_space<vmem>>, %arg6: memref<2x8xf32, #tpu.memory_space<vmem>>) attributes {dimension_semantics = [], scalar_prefetch = 0 : i64, scratch_operands = 0 : i64, tpu.core_type = #tpu.core_type<tc>} {
    %0 = tpu.iota {dimensions = array<i32: 1>} : vector<2x256xi32>
    %c128_i32 = arith.constant 128 : i32
    %1 = vector.broadcast %c128_i32 : i32 to vector<2x256xi32>
    %2 = arith.cmpi sge, %0, %1 : vector<2x256xi32>
    %c192_i32 = arith.constant 192 : i32
    %3 = vector.broadcast %c192_i32 : i32 to vector<2x256xi32>
    %4 = arith.cmpi slt, %0, %3 : vector<2x256xi32>
    %5 = arith.andi %2, %4 : vector<2x256xi1>
    %cst = arith.constant 1.000000e+00 : f32
    %cst_0 = arith.constant 5.000000e-01 : f32
    %6 = vector.broadcast %cst : f32 to vector<2x256xf32>
    %7 = vector.broadcast %cst_0 : f32 to vector<2x256xf32>
    %8 = arith.select %5, %6, %7 : vector<2x256xi1>, vector<2x256xf32>
    %cst_1 = arith.constant 0.000000e+00 : f32
    %cst_2 = arith.constant 5.000000e-01 : f32
    %9 = vector.broadcast %cst_1 : f32 to vector<2x256xf32>
    %10 = vector.broadcast %cst_2 : f32 to vector<2x256xf32>
    %11 = arith.select %5, %9, %10 : vector<2x256xi1>, vector<2x256xf32>
    %12 = tpu.iota {dimensions = array<i32: 1>} : vector<2x64xi32>
    %c0 = arith.constant 0 : index
    %c0_3 = arith.constant 0 : index
    %13 = vector.load %arg2[%c0, %c0_3] : memref<1x256xf32, #tpu.memory_space<vmem>>, vector<1x256xf32>
    %c0_4 = arith.constant 0 : index
    %c0_5 = arith.constant 0 : index
    %14 = vector.load %arg0[%c0_4, %c0_5] : memref<16x4xf32, #tpu.memory_space<vmem>>, vector<16x4xf32>
    %c0_6 = arith.constant 0 : index
    %c0_7 = arith.constant 0 : index
    %15 = vector.load %arg1[%c0_6, %c0_7] : memref<4x256xf32, #tpu.memory_space<vmem>>, vector<4x256xf32>
    %cst_8 = arith.constant dense<0.000000e+00> : vector<16x256xf32>
    %16 = tpu.matmul %14, %15, %cst_8 {dimension_numbers = #tpu.dot_dimension_numbers<[1], [0], [0], [1], [0, 0, 1, 1], [], []>} : vector<16x4xf32>, vector<4x256xf32>, vector<16x256xf32> -> vector<16x256xf32>
    %17 = vector.broadcast %13 : vector<1x256xf32> to vector<16x256xf32>
    %18 = arith.addf %16, %17 : vector<16x256xf32>
    %c0_9 = arith.constant 0 : index
    %c0_10 = arith.constant 0 : index
    %19 = vector.load %arg3[%c0_9, %c0_10] : memref<64x256xf32, #tpu.memory_space<vmem>>, vector<64x256xf32>
    %cst_11 = arith.constant 0.000000e+00 : f32
    %20 = vector.broadcast %cst_11 : f32 to vector<2x64xf32>
    %cst_12 = arith.constant 0.000000e+00 : f32
    %21 = vector.broadcast %cst_12 : f32 to vector<2x64xf32>
    %22 = vector.extract_strided_slice %18 {offsets = [0, 0], sizes = [2, 256], strides = [1, 1]} : vector<16x256xf32> to vector<2x256xf32>
    %23 = arith.mulf %22, %8 : vector<2x256xf32>
    %24 = math.tanh %23 : vector<2x256xf32>
    %25 = arith.mulf %24, %8 : vector<2x256xf32>
    %26 = arith.addf %25, %11 : vector<2x256xf32>
    %27 = vector.extract_strided_slice %26 {offsets = [0, 0], sizes = [2, 64], strides = [1, 1]} : vector<2x256xf32> to vector<2x64xf32>
    %28 = vector.extract_strided_slice %26 {offsets = [0, 64], sizes = [2, 64], strides = [1, 1]} : vector<2x256xf32> to vector<2x64xf32>
    %29 = vector.extract_strided_slice %26 {offsets = [0, 128], sizes = [2, 64], strides = [1, 1]} : vector<2x256xf32> to vector<2x64xf32>
    %30 = vector.extract_strided_slice %26 {offsets = [0, 192], sizes = [2, 64], strides = [1, 1]} : vector<2x256xf32> to vector<2x64xf32>
    %31 = arith.mulf %28, %21 : vector<2x64xf32>
    %32 = arith.mulf %27, %29 : vector<2x64xf32>
    %33 = arith.addf %31, %32 : vector<2x64xf32>
    %34 = math.tanh %33 : vector<2x64xf32>
    %35 = arith.mulf %30, %34 : vector<2x64xf32>
    %c0_i32 = arith.constant 0 : i32
    %36 = vector.broadcast %c0_i32 : i32 to vector<2x64xi32>
    %37 = arith.cmpi sge, %12, %36 : vector<2x64xi32>
    %c32_i32 = arith.constant 32 : i32
    %38 = vector.broadcast %c32_i32 : i32 to vector<2x64xi32>
    %39 = arith.cmpi slt, %12, %38 : vector<2x64xi32>
    %40 = arith.andi %37, %39 : vector<2x64xi1>
    %41 = arith.select %40, %33, %21 : vector<2x64xi1>, vector<2x64xf32>
    %42 = arith.select %40, %35, %20 : vector<2x64xi1>, vector<2x64xf32>
    %43 = vector.extract_strided_slice %18 {offsets = [2, 0], sizes = [2, 256], strides = [1, 1]} : vector<16x256xf32> to vector<2x256xf32>
    %cst_13 = arith.constant dense<0.000000e+00> : vector<2x256xf32>
    %44 = tpu.matmul %42, %19, %cst_13 {dimension_numbers = #tpu.dot_dimension_numbers<[1], [0], [0], [1], [0, 0, 1, 1], [], []>} : vector<2x64xf32>, vector<64x256xf32>, vector<2x256xf32> -> vector<2x256xf32>
    %45 = arith.addf %44, %43 : vector<2x256xf32>
    %46 = arith.mulf %45, %8 : vector<2x256xf32>
    %47 = math.tanh %46 : vector<2x256xf32>
    %48 = arith.mulf %47, %8 : vector<2x256xf32>
    %49 = arith.addf %48, %11 : vector<2x256xf32>
    %50 = vector.extract_strided_slice %49 {offsets = [0, 0], sizes = [2, 64], strides = [1, 1]} : vector<2x256xf32> to vector<2x64xf32>
    %51 = vector.extract_strided_slice %49 {offsets = [0, 64], sizes = [2, 64], strides = [1, 1]} : vector<2x256xf32> to vector<2x64xf32>
    %52 = vector.extract_strided_slice %49 {offsets = [0, 128], sizes = [2, 64], strides = [1, 1]} : vector<2x256xf32> to vector<2x64xf32>
    %53 = vector.extract_strided_slice %49 {offsets = [0, 192], sizes = [2, 64], strides = [1, 1]} : vector<2x256xf32> to vector<2x64xf32>
    %54 = arith.mulf %51, %41 : vector<2x64xf32>
    %55 = arith.mulf %50, %52 : vector<2x64xf32>
    %56 = arith.addf %54, %55 : vector<2x64xf32>
    %57 = math.tanh %56 : vector<2x64xf32>
    %58 = arith.mulf %53, %57 : vector<2x64xf32>
    %59 = vector.extract_strided_slice %18 {offsets = [4, 0], sizes = [2, 256], strides = [1, 1]} : vector<16x256xf32> to vector<2x256xf32>
    %cst_14 = arith.constant dense<0.000000e+00> : vector<2x256xf32>
    %60 = tpu.matmul %58, %19, %cst_14 {dimension_numbers = #tpu.dot_dimension_numbers<[1], [0], [0], [1], [0, 0, 1, 1], [], []>} : vector<2x64xf32>, vector<64x256xf32>, vector<2x256xf32> -> vector<2x256xf32>
    %61 = arith.addf %60, %59 : vector<2x256xf32>
    %62 = arith.mulf %61, %8 : vector<2x256xf32>
    %63 = math.tanh %62 : vector<2x256xf32>
    %64 = arith.mulf %63, %8 : vector<2x256xf32>
    %65 = arith.addf %64, %11 : vector<2x256xf32>
    %66 = vector.extract_strided_slice %65 {offsets = [0, 0], sizes = [2, 64], strides = [1, 1]} : vector<2x256xf32> to vector<2x64xf32>
    %67 = vector.extract_strided_slice %65 {offsets = [0, 64], sizes = [2, 64], strides = [1, 1]} : vector<2x256xf32> to vector<2x64xf32>
    %68 = vector.extract_strided_slice %65 {offsets = [0, 128], sizes = [2, 64], strides = [1, 1]} : vector<2x256xf32> to vector<2x64xf32>
    %69 = vector.extract_strided_slice %65 {offsets = [0, 192], sizes = [2, 64], strides = [1, 1]} : vector<2x256xf32> to vector<2x64xf32>
    %70 = arith.mulf %67, %56 : vector<2x64xf32>
    %71 = arith.mulf %66, %68 : vector<2x64xf32>
    %72 = arith.addf %70, %71 : vector<2x64xf32>
    %73 = math.tanh %72 : vector<2x64xf32>
    %74 = arith.mulf %69, %73 : vector<2x64xf32>
    %75 = vector.extract_strided_slice %18 {offsets = [6, 0], sizes = [2, 256], strides = [1, 1]} : vector<16x256xf32> to vector<2x256xf32>
    %cst_15 = arith.constant dense<0.000000e+00> : vector<2x256xf32>
    %76 = tpu.matmul %74, %19, %cst_15 {dimension_numbers = #tpu.dot_dimension_numbers<[1], [0], [0], [1], [0, 0, 1, 1], [], []>} : vector<2x64xf32>, vector<64x256xf32>, vector<2x256xf32> -> vector<2x256xf32>
    %77 = arith.addf %76, %75 : vector<2x256xf32>
    %78 = arith.mulf %77, %8 : vector<2x256xf32>
    %79 = math.tanh %78 : vector<2x256xf32>
    %80 = arith.mulf %79, %8 : vector<2x256xf32>
    %81 = arith.addf %80, %11 : vector<2x256xf32>
    %82 = vector.extract_strided_slice %81 {offsets = [0, 0], sizes = [2, 64], strides = [1, 1]} : vector<2x256xf32> to vector<2x64xf32>
    %83 = vector.extract_strided_slice %81 {offsets = [0, 64], sizes = [2, 64], strides = [1, 1]} : vector<2x256xf32> to vector<2x64xf32>
    %84 = vector.extract_strided_slice %81 {offsets = [0, 128], sizes = [2, 64], strides = [1, 1]} : vector<2x256xf32> to vector<2x64xf32>
    %85 = vector.extract_strided_slice %81 {offsets = [0, 192], sizes = [2, 64], strides = [1, 1]} : vector<2x256xf32> to vector<2x64xf32>
    %86 = arith.mulf %83, %72 : vector<2x64xf32>
    %87 = arith.mulf %82, %84 : vector<2x64xf32>
    %88 = arith.addf %86, %87 : vector<2x64xf32>
    %89 = math.tanh %88 : vector<2x64xf32>
    %90 = arith.mulf %85, %89 : vector<2x64xf32>
    %91 = vector.extract_strided_slice %18 {offsets = [8, 0], sizes = [2, 256], strides = [1, 1]} : vector<16x256xf32> to vector<2x256xf32>
    %cst_16 = arith.constant dense<0.000000e+00> : vector<2x256xf32>
    %92 = tpu.matmul %90, %19, %cst_16 {dimension_numbers = #tpu.dot_dimension_numbers<[1], [0], [0], [1], [0, 0, 1, 1], [], []>} : vector<2x64xf32>, vector<64x256xf32>, vector<2x256xf32> -> vector<2x256xf32>
    %93 = arith.addf %92, %91 : vector<2x256xf32>
    %94 = arith.mulf %93, %8 : vector<2x256xf32>
    %95 = math.tanh %94 : vector<2x256xf32>
    %96 = arith.mulf %95, %8 : vector<2x256xf32>
    %97 = arith.addf %96, %11 : vector<2x256xf32>
    %98 = vector.extract_strided_slice %97 {offsets = [0, 0], sizes = [2, 64], strides = [1, 1]} : vector<2x256xf32> to vector<2x64xf32>
    %99 = vector.extract_strided_slice %97 {offsets = [0, 64], sizes = [2, 64], strides = [1, 1]} : vector<2x256xf32> to vector<2x64xf32>
    %100 = vector.extract_strided_slice %97 {offsets = [0, 128], sizes = [2, 64], strides = [1, 1]} : vector<2x256xf32> to vector<2x64xf32>
    %101 = vector.extract_strided_slice %97 {offsets = [0, 192], sizes = [2, 64], strides = [1, 1]} : vector<2x256xf32> to vector<2x64xf32>
    %102 = arith.mulf %99, %88 : vector<2x64xf32>
    %103 = arith.mulf %98, %100 : vector<2x64xf32>
    %104 = arith.addf %102, %103 : vector<2x64xf32>
    %105 = math.tanh %104 : vector<2x64xf32>
    %106 = arith.mulf %101, %105 : vector<2x64xf32>
    %107 = vector.extract_strided_slice %18 {offsets = [10, 0], sizes = [2, 256], strides = [1, 1]} : vector<16x256xf32> to vector<2x256xf32>
    %cst_17 = arith.constant dense<0.000000e+00> : vector<2x256xf32>
    %108 = tpu.matmul %106, %19, %cst_17 {dimension_numbers = #tpu.dot_dimension_numbers<[1], [0], [0], [1], [0, 0, 1, 1], [], []>} : vector<2x64xf32>, vector<64x256xf32>, vector<2x256xf32> -> vector<2x256xf32>
    %109 = arith.addf %108, %107 : vector<2x256xf32>
    %110 = arith.mulf %109, %8 : vector<2x256xf32>
    %111 = math.tanh %110 : vector<2x256xf32>
    %112 = arith.mulf %111, %8 : vector<2x256xf32>
    %113 = arith.addf %112, %11 : vector<2x256xf32>
    %114 = vector.extract_strided_slice %113 {offsets = [0, 0], sizes = [2, 64], strides = [1, 1]} : vector<2x256xf32> to vector<2x64xf32>
    %115 = vector.extract_strided_slice %113 {offsets = [0, 64], sizes = [2, 64], strides = [1, 1]} : vector<2x256xf32> to vector<2x64xf32>
    %116 = vector.extract_strided_slice %113 {offsets = [0, 128], sizes = [2, 64], strides = [1, 1]} : vector<2x256xf32> to vector<2x64xf32>
    %117 = vector.extract_strided_slice %113 {offsets = [0, 192], sizes = [2, 64], strides = [1, 1]} : vector<2x256xf32> to vector<2x64xf32>
    %118 = arith.mulf %115, %104 : vector<2x64xf32>
    %119 = arith.mulf %114, %116 : vector<2x64xf32>
    %120 = arith.addf %118, %119 : vector<2x64xf32>
    %121 = math.tanh %120 : vector<2x64xf32>
    %122 = arith.mulf %117, %121 : vector<2x64xf32>
    %123 = vector.extract_strided_slice %18 {offsets = [12, 0], sizes = [2, 256], strides = [1, 1]} : vector<16x256xf32> to vector<2x256xf32>
    %cst_18 = arith.constant dense<0.000000e+00> : vector<2x256xf32>
    %124 = tpu.matmul %122, %19, %cst_18 {dimension_numbers = #tpu.dot_dimension_numbers<[1], [0], [0], [1], [0, 0, 1, 1], [], []>} : vector<2x64xf32>, vector<64x256xf32>, vector<2x256xf32> -> vector<2x256xf32>
    %125 = arith.addf %124, %123 : vector<2x256xf32>
    %126 = arith.mulf %125, %8 : vector<2x256xf32>
    %127 = math.tanh %126 : vector<2x256xf32>
    %128 = arith.mulf %127, %8 : vector<2x256xf32>
    %129 = arith.addf %128, %11 : vector<2x256xf32>
    %130 = vector.extract_strided_slice %129 {offsets = [0, 0], sizes = [2, 64], strides = [1, 1]} : vector<2x256xf32> to vector<2x64xf32>
    %131 = vector.extract_strided_slice %129 {offsets = [0, 64], sizes = [2, 64], strides = [1, 1]} : vector<2x256xf32> to vector<2x64xf32>
    %132 = vector.extract_strided_slice %129 {offsets = [0, 128], sizes = [2, 64], strides = [1, 1]} : vector<2x256xf32> to vector<2x64xf32>
    %133 = vector.extract_strided_slice %129 {offsets = [0, 192], sizes = [2, 64], strides = [1, 1]} : vector<2x256xf32> to vector<2x64xf32>
    %134 = arith.mulf %131, %120 : vector<2x64xf32>
    %135 = arith.mulf %130, %132 : vector<2x64xf32>
    %136 = arith.addf %134, %135 : vector<2x64xf32>
    %137 = math.tanh %136 : vector<2x64xf32>
    %138 = arith.mulf %133, %137 : vector<2x64xf32>
    %139 = vector.extract_strided_slice %18 {offsets = [14, 0], sizes = [2, 256], strides = [1, 1]} : vector<16x256xf32> to vector<2x256xf32>
    %cst_19 = arith.constant dense<0.000000e+00> : vector<2x256xf32>
    %140 = tpu.matmul %138, %19, %cst_19 {dimension_numbers = #tpu.dot_dimension_numbers<[1], [0], [0], [1], [0, 0, 1, 1], [], []>} : vector<2x64xf32>, vector<64x256xf32>, vector<2x256xf32> -> vector<2x256xf32>
    %141 = arith.addf %140, %139 : vector<2x256xf32>
    %142 = arith.mulf %141, %8 : vector<2x256xf32>
    %143 = math.tanh %142 : vector<2x256xf32>
    %144 = arith.mulf %143, %8 : vector<2x256xf32>
    %145 = arith.addf %144, %11 : vector<2x256xf32>
    %146 = vector.extract_strided_slice %145 {offsets = [0, 0], sizes = [2, 64], strides = [1, 1]} : vector<2x256xf32> to vector<2x64xf32>
    %147 = vector.extract_strided_slice %145 {offsets = [0, 64], sizes = [2, 64], strides = [1, 1]} : vector<2x256xf32> to vector<2x64xf32>
    %148 = vector.extract_strided_slice %145 {offsets = [0, 128], sizes = [2, 64], strides = [1, 1]} : vector<2x256xf32> to vector<2x64xf32>
    %149 = vector.extract_strided_slice %145 {offsets = [0, 192], sizes = [2, 64], strides = [1, 1]} : vector<2x256xf32> to vector<2x64xf32>
    %150 = arith.mulf %147, %136 : vector<2x64xf32>
    %151 = arith.mulf %146, %148 : vector<2x64xf32>
    %152 = arith.addf %150, %151 : vector<2x64xf32>
    %153 = math.tanh %152 : vector<2x64xf32>
    %154 = arith.mulf %149, %153 : vector<2x64xf32>
    %cst_20 = arith.constant dense<0.000000e+00> : vector<2x256xf32>
    %155 = tpu.matmul %154, %19, %cst_20 {dimension_numbers = #tpu.dot_dimension_numbers<[1], [0], [0], [1], [0, 0, 1, 1], [], []>} : vector<2x64xf32>, vector<64x256xf32>, vector<2x256xf32> -> vector<2x256xf32>
    %156 = vector.broadcast %13 : vector<1x256xf32> to vector<2x256xf32>
    %157 = arith.addf %155, %156 : vector<2x256xf32>
    %158 = arith.mulf %157, %8 : vector<2x256xf32>
    %159 = math.tanh %158 : vector<2x256xf32>
    %160 = arith.mulf %159, %8 : vector<2x256xf32>
    %161 = arith.addf %160, %11 : vector<2x256xf32>
    %162 = vector.extract_strided_slice %161 {offsets = [0, 0], sizes = [2, 64], strides = [1, 1]} : vector<2x256xf32> to vector<2x64xf32>
    %163 = vector.extract_strided_slice %161 {offsets = [0, 64], sizes = [2, 64], strides = [1, 1]} : vector<2x256xf32> to vector<2x64xf32>
    %164 = vector.extract_strided_slice %161 {offsets = [0, 128], sizes = [2, 64], strides = [1, 1]} : vector<2x256xf32> to vector<2x64xf32>
    %165 = vector.extract_strided_slice %161 {offsets = [0, 192], sizes = [2, 64], strides = [1, 1]} : vector<2x256xf32> to vector<2x64xf32>
    %166 = arith.mulf %163, %152 : vector<2x64xf32>
    %167 = arith.mulf %162, %164 : vector<2x64xf32>
    %168 = arith.addf %166, %167 : vector<2x64xf32>
    %169 = math.tanh %168 : vector<2x64xf32>
    %170 = arith.mulf %165, %169 : vector<2x64xf32>
    %c32_i32_21 = arith.constant 32 : i32
    %171 = vector.broadcast %c32_i32_21 : i32 to vector<2x64xi32>
    %172 = arith.cmpi sge, %12, %171 : vector<2x64xi32>
    %c64_i32 = arith.constant 64 : i32
    %173 = vector.broadcast %c64_i32 : i32 to vector<2x64xi32>
    %174 = arith.cmpi slt, %12, %173 : vector<2x64xi32>
    %175 = arith.andi %172, %174 : vector<2x64xi1>
    %176 = arith.select %175, %170, %154 : vector<2x64xi1>, vector<2x64xf32>
    %177 = vector.extract_strided_slice %176 {offsets = [0, 32], sizes = [2, 32], strides = [1, 1]} : vector<2x64xf32> to vector<2x32xf32>
    %c0_22 = arith.constant 0 : index
    %c0_23 = arith.constant 0 : index
    %178 = vector.load %arg4[%c0_22, %c0_23] : memref<32x8xf32, #tpu.memory_space<vmem>>, vector<32x8xf32>
    %cst_24 = arith.constant dense<0.000000e+00> : vector<2x8xf32>
    %179 = tpu.matmul %177, %178, %cst_24 {dimension_numbers = #tpu.dot_dimension_numbers<[1], [0], [0], [1], [0, 0, 1, 1], [], []>} : vector<2x32xf32>, vector<32x8xf32>, vector<2x8xf32> -> vector<2x8xf32>
    %c0_25 = arith.constant 0 : index
    %c0_26 = arith.constant 0 : index
    %180 = vector.load %arg5[%c0_25, %c0_26] : memref<1x8xf32, #tpu.memory_space<vmem>>, vector<1x8xf32>
    %181 = vector.broadcast %180 : vector<1x8xf32> to vector<2x8xf32>
    %182 = arith.addf %179, %181 : vector<2x8xf32>
    %c0_27 = arith.constant 0 : index
    %c0_28 = arith.constant 0 : index
    %183 = vector.load %arg6[%c0_27, %c0_28] : memref<2x8xf32, #tpu.memory_space<vmem>>, vector<2x8xf32>
    tpu.vector_store %arg6[%c0_27, %c0_28], %182 {strides = array<i32>} : memref<2x8xf32, #tpu.memory_space<vmem>>, vector<2x8xf32>,
    return
  }
}

</mosaic_0001>

<bundles_post_ra>
// kernel: lstm1_forward.1
= control target key start
LH: loop header
LB: loop body
LE: loop exit
PB: predicated region body
PF: predicated region fallthrough
CT: control target
= control target key end

     0   :  { %11 = vsyncpa [#allocation3], 0  ;;  %s1662_s0 = inlined_call_operand.vmem [shape: f32[16,4], index: 0, kind: input, shape index: {}]   ;;  %s1663_s1 = inlined_call_operand.vmem [shape: f32[4,256], index: 1, kind: input, shape index: {}]   ;;  %s1664_s2 = inlined_call_operand.vmem [shape: f32[1,256], index: 2, kind: input, shape index: {}]   ;;  %s1665_s3 = inlined_call_operand.hbm [shape: f32[64,256], index: 3, kind: input, shape index: {}]   ;;  %s1666_s4 = inlined_call_operand.vmem [shape: f32[32,8], index: 4, kind: input, shape index: {}]   ;;  %s1667_s5 = inlined_call_operand.vmem [shape: f32[1,8], index: 5, kind: input, shape index: {}]   ;;  %s1668_s6 = inlined_call_operand.hbm [shape: f32[2,8], index: 6, kind: output, shape index: {}]  }
   0x1   :  { %12 = vsyncpa [#allocation4], 0  ;;  %s1368_s21 = smov [#allocation2]   ;;  %s1320_s25 = scalar_lea.hbm %s1665_s3, 2048 }
   0x2   :  { %s24_s22 = sshll.u32 %s1368_s21, 4  ;;  %p1321_p0 = scmp.ne.s32.totalorder %s1665_s3, %s1320_s25  ;;  %s25_s22 = int_to_ptr.vmem [resolvable:$true] %s24_s22 }
   0x3   :  { %p1324_p1 = scmp.lt.u32.totalorder %s1320_s25, %s1665_s3 }
   0x5   :  { %p1326_p2 = pnand %p1324_p1, %p1321_p0 }
   0x7   :  { %1329 = shalt.err (!%p1326_p2)
}
   0x8   :  { %s1330_s30 = scalar_lea.vmem %s25_s22, 2048  ;;  %p1335_p4 = scmp.lt.s32.totalorder %s25_s22, %s25_s22 }
   0x9   :  { %p1331_p3 = scmp.ne.s32.totalorder %s25_s22, %s1330_s30  ;;  %p1336_p5 = scmp.lt.s32.totalorder %s1330_s30, %s1330_s30 }
   0xb   :  { %p1337_p6 = por %p1336_p5, %p1335_p4 }
   0xd   :  { %p1338_p7 = pnand %p1337_p6, %p1331_p3 }
   0xf   :  { %1341 = shalt.err (!%p1338_p7)
}
  0x10   :  { %s1369_s7 = smov 256   ;;  %s1370_s8 = smov 16  }
  0x11   :  { %30 = dma.hbm_to_vmem [thread:$0]  %s1665_s3, 2048, %s25_s22, [#allocation3], %s1369_s7, %s1369_s7, %s1370_s8  }
  0x12   :  { %1364 = dma.done.wait [#allocation3], 2048  }
  0x13   :  { %1365 = vsyncadd [#allocation3], 4294965248  ;;  %v1371_v0 = vmov 0.0   ;;  %v54_v1 = vld [vmem:[%s1663_s1] sm:$0xff]  ;;  %vm75_vm0 = vcmask 1043456   ;;  %vm68_vm1 = vcmask 31744   ;;  %v38_v4 = vlaneseq }
  0x14   :  { %144 = vmatprep.mubr.f32.mxu0 %v1371_v0  ;;  %277 = vmatprep.mubr.f32.mxu1 %v1371_v0  ;;  %v67_v2 = vcombine.high %v54_v1, %v54_v1  ;;  %v52_v3 = vld [vmem:[%s1662_s0] sm:$0xff]  ;;  %v1372_v14 = vmov 0.5   ;;  %v158_v29 = vld [vmem:[#allocation2 + $0x8] sm:$0xff]  ;;  %v160_v30 = vld [vmem:[#allocation2 + $0x18] sm:$0xff]  ;;  %vm209_vm4 = vcmask 523264   ;;  %vm1375_vm5 = vmmov 0  }
  0x15   :  { %v57_v5 = vshrl.u32 %v38_v4, 7  ;;  %v1435_v6 = vand.u32 127, %v38_v4  ;;  %v51_v9 = vld [vmem:[%s1664_s2] sm:$0x3]  ;;  %s1373_s2 = smov 64   ;;  %v1461_v32 = vpack.c.bf16 %v160_v30, %v158_v29  ;;  %v159_v33 = vld [vmem:[#allocation2 + $0x10] sm:$0xff] }
  0x16   :  { %1091 = vmatprep.subr.msk.mxu0 %vm75_vm0, %v67_v2  ;;  %v157_v31 = vld [vmem:[#allocation2] sm:$0xff]  ;;  %v162_v35 = vld [vmem:[#allocation2 + $0x28] sm:$0xff]  ;;  %v164_v36 = vld [vmem:[#allocation2 + $0x38] sm:$0xff]  ;;  %s1376_s24 = smov 96   ;;  %vm1001_vm9 = vcmask 261120   ;;  %s1377_s26 = smov [#allocation5]  }
  0x17   :  { %1092 = vmatpush1.msk.msra.mxu0 %vm75_vm0, %v54_v1  ;;  %v58_v7 = vsub.s32 0, %v57_v5  ;;  %v40_v8 = vadd.s32 128, %v1435_v6  ;;  %v62_v10 = vsub.s32 1, %v57_v5  ;;  %v1463_v34 = vpack.c.bf16 %v159_v33, %v157_v31  ;;  %1122 = vmatprep.subr.bf16.mxu1 %v1461_v32  ;;  %v161_v38 = vld [vmem:[#allocation2 + $0x20] sm:$0xff]  ;;  %v163_v39 = vld [vmem:[#allocation2 + $0x30] sm:$0xff]  ;;  %v166_v41 = vld [vmem:[#allocation2 + $0x48] sm:$0xff] }
  0x18   :  { %1093 = vmatmul.mubr.msk.f32.vlgmr.msra.gmra.mrb[0].mxu0 %vm68_vm1, %v52_v3  ;;  %1138 = vmatprep.subr.bf16.mxu0 %v1461_v32  ;;  %v1469_v37 = vpack.c.bf16 %v164_v36, %v162_v35  ;;  %v1471_v40 = vpack.c.bf16 %v163_v39, %v161_v38  ;;  %v168_v42 = vld [vmem:[#allocation2 + $0x58] sm:$0xff]  ;;  %v165_v43 = vld [vmem:[#allocation2 + $0x40] sm:$0xff]  ;;  %v167_v45 = vld [vmem:[#allocation2 + $0x50] sm:$0xff]  ;;  %vm191_vm3 = vcmp.lt.s32.totalorder %v1435_v6, 32  ;;  %vm978_vm6 = vcmp.ge.s32.totalorder %v1435_v6, 32  ;;  %s1082_s27 = sshll.u32 %s1377_s26, 4  ;;  %s1083_s27 = int_to_ptr.vmem [resolvable:$true] %s1082_s27 }
  0x19   :  { %150 = vmatprep.mubr.f32.mxu0 %v1371_v0  ;;  %v1441_v11 = vrot.slane %v51_v9, %v58_v7  ;;  %vm44_vm2 = vcmp.lt.s32.totalorder %v40_v8, 192  ;;  %v1443_v12 = vrot.slane %v51_v9, %v62_v10  ;;  %1124 = vmatpush1.bf16.msra.mxu1 %v1463_v34  ;;  %v1474_v44 = vpack.c.bf16 %v168_v42, %v166_v41  ;;  %v170_v46 = vld [vmem:[#allocation2 + $0x68] sm:$0xff]  ;;  %v172_v47 = vld [vmem:[#allocation2 + $0x78] sm:$0xff]  ;;  %v169_v50 = vld [vmem:[#allocation2 + $0x60] sm:$0xff]  ;;  %s1342_s28 = scalar_lea.vmem %s1083_s27, 32  ;;  %p1347_p9 = scmp.lt.s32.totalorder %s1083_s27, %s1083_s27 }
  0x1a   :  { %v1445_v15 = vsel %vm44_vm2, 1.0, %v1372_v14  ;;  %v1456_v23 = vsel %vm44_vm2, 0.0, %v1372_v14  ;;  %1140 = vmatpush1.bf16.msra.mxu0 %v1463_v34  ;;  %1126 = vmatprep.subr.bf16.mxu1 %v1469_v37  ;;  %v1478_v48 = vpack.c.bf16 %v167_v45, %v165_v43  ;;  %v1482_v49 = vpack.c.bf16 %v172_v47, %v170_v46  ;;  %v171_v51 = vld [vmem:[#allocation2 + $0x70] sm:$0xff]  ;;  %p1343_p8 = scmp.ne.s32.totalorder %s1083_s27, %s1342_s28  ;;  %p1348_p10 = scmp.lt.s32.totalorder %s1342_s28, %s1342_s28 }
  0x1b   :  { %1142 = vmatprep.subr.bf16.mxu0 %v1469_v37  ;;  %v1486_v52 = vpack.c.bf16 %v171_v51, %v169_v50  ;;  %vm979_vm7 = vcmp.lt.s32.totalorder %v1435_v6, 64  ;;  %vm1074_vm10 = vcmask 58368  }
  0x1c   :  { %vm980_vm8 = vmand %vm978_vm6, %vm979_vm7  ;;  %p1349_p11 = por %p1348_p10, %p1347_p9 }
  0x1d   :  { %1128 = vmatpush1.bf16.msra.mxu1 %v1471_v40 }
  0x1e   :  { %1144 = vmatpush1.bf16.msra.mxu0 %v1471_v40  ;;  %1130 = vmatprep.subr.bf16.mxu1 %v1474_v44  ;;  %p1350_p12 = pnand %p1349_p11, %p1343_p8 }
  0x1f   :  { %1146 = vmatprep.subr.bf16.mxu0 %v1474_v44 }
  0x21   :  { %1132 = vmatpush1.bf16.msra.mxu1 %v1478_v48 }
  0x22   :  { %1148 = vmatpush1.bf16.msra.mxu0 %v1478_v48  ;;  %1134 = vmatprep.subr.bf16.mxu1 %v1482_v49 }
  0x23   :  { %1150 = vmatprep.subr.bf16.mxu0 %v1482_v49 }
  0x25   :  { %1136 = vmatpush1.bf16.msra.mxu1 %v1486_v52 }
  0x26   :  { %1152 = vmatpush1.bf16.msra.mxu0 %v1486_v52  ;;  %1154 = vmatprep.subr.bf16.mxu1 %v1461_v32 }
  0x27   :  { %1170 = vmatprep.subr.bf16.mxu0 %v1461_v32 }
  0xeb   :  { %v146_v13 = vpop.f32.mrb[0].mxu0 }
  0xec   :  { %v1448_v16 = vadd.f32 %v146_v13, %v1441_v11  ;;  %v148_v17 = vpop.f32.mrb[1].mxu0 }
  0xed   :  { %v1451_v18 = vadd.f32 %v148_v17, %v1443_v12 }
  0xee   :  { %v173_v19 = vmul.f32 0.5, %v1448_v16  ;;  %v205_v62 = vrot.slane %v1448_v16, 2  ;;  %v308_v31 = vrot.slane %v1448_v16, 4 }
  0xef   :  { %v174_v20 = vmul.f32 %v1451_v18, %v1445_v15  ;;  %v206_v1 = vrot.slane %v1451_v18, 2  ;;  %v309_v35 = vrot.slane %v1451_v18, 4 }
  0xf0   :  { %1266 = vtanh.f32 %v173_v19 }
  0xf1   :  { %1268 = vtanh.f32 %v174_v20  ;;  %v53_v20 = vld [vmem:[%s1662_s0 + $0x8] sm:$0xff] }
  0xf2   :  { %1094 = vmatmul.mubr.msk.f32.gmra.mrb[2].mxu0 %vm68_vm1, %v53_v20 }
  0xf3   :  { %378 = vmatprep.mubr.f32.mxu0 %v1371_v0 }
  0xfa   :  { %v1267_v21 = vpop.eup %1266 }
  0xfb   :  { %v1269_v22 = vpop.eup %1268  ;;  %v177_v24 = vmul.f32 0.5, %v1267_v21 }
  0xfc   :  { %v178_v25 = vmul.f32 %v1269_v22, %v1445_v15 }
  0xfd   :  { %v179_v26 = vadd.f32 0.5, %v177_v24 }
  0xfe   :  { %v180_v27 = vadd.f32 %v178_v25, %v1456_v23 }
  0xff   :  { %v181_v53 = vmul.f32 0.0, %v179_v26 }
 0x100   :  { %v182_v28 = vmul.f32 %v180_v27, %v179_v26 }
 0x102   :  { %184 = vrot.lane.b32.xlu0 %v182_v28, %s1373_s2 }
 0x174   :  { %v185_v54 = vpop.permute.xlu0 %184 }
 0x175   :  { %v187_v55 = vadd.f32 %v185_v54, %v181_v53 }
 0x177   :  { %1270 = vtanh.f32 %v187_v55  ;;  %194 = vrot.lane.b32.xlu1 %v187_v55, %s1373_s2 }
 0x181   :  { %v1271_v56 = vpop.eup %1270 }
 0x182   :  { %v189_v57 = vmul.f32 %v1271_v56, %v180_v27 }
 0x184   :  { %199 = vrot.lane.b32.xlu0 %v189_v57, %s1373_s2 }
 0x1c5   :  { %v1521_v28 = vpop.f32.mrb[2].mxu0 }
 0x1c6   :  { %v1523_v29 = vpop.f32.mrb[3].mxu0 }
 0x1e9   :  { %v195_v58 = vpop.permute.xlu1 %194 }
 0x1ea   :  { %v197_v59 = vsel %vm191_vm3, %v195_v58, 0.0 }
 0x1eb   :  { %293 = vrot.lane.b32.xlu1 %v197_v59, %s1373_s2 }
 0x1f6   :  { %v200_v60 = vpop.permute.xlu0 %199 }
 0x1f7   :  { %v202_v61 = vsel %vm191_vm3, %v200_v60, 0.0  ;;  %v405_v60 = vrot.slane %v1448_v16, 6 }
 0x1f8   :  { %1095 = vmatmul.mubr.msk.f32.vlgmr.msra.gmra.mrb[0].mxu1 %vm209_vm4, %v202_v61 }
 0x1f9   :  { %1156 = vmatpush1.bf16.msra.mxu1 %v1463_v34  ;;  %475 = vmatprep.mubr.f32.mxu1 %v1371_v0 }
 0x1fa   :  { %1158 = vmatprep.subr.bf16.mxu1 %v1469_v37 }
 0x1fd   :  { %1160 = vmatpush1.bf16.msra.mxu1 %v1471_v40 }
 0x1fe   :  { %1162 = vmatprep.subr.bf16.mxu1 %v1474_v44 }
 0x201   :  { %1164 = vmatpush1.bf16.msra.mxu1 %v1478_v48 }
 0x202   :  { %1166 = vmatprep.subr.bf16.mxu1 %v1482_v49 }
 0x205   :  { %1168 = vmatpush1.bf16.msra.mxu1 %v1486_v52 }
 0x206   :  { %1186 = vmatprep.subr.bf16.mxu1 %v1461_v32 }
 0x25d   :  { %v294_v21 = vpop.permute.xlu1 %293 }
 0x2cb   :  { %v279_v63 = vpop.f32.mrb[0].mxu1 }
 0x2cc   :  { %v280_v2 = vadd.f32 %v279_v63, %v205_v62  ;;  %v281_v3 = vpop.f32.mrb[1].mxu1  ;;  %v406_v62 = vrot.slane %v1451_v18, 6 }
 0x2cd   :  { %v282_v4 = vadd.f32 %v281_v3, %v206_v1 }
 0x2ce   :  { %v284_v5 = vmul.f32 0.5, %v280_v2 }
 0x2cf   :  { %v285_v7 = vmul.f32 %v282_v4, %v1445_v15 }
 0x2d0   :  { %1272 = vtanh.f32 %v284_v5 }
 0x2d1   :  { %1274 = vtanh.f32 %v285_v7 }
 0x2da   :  { %v1273_v8 = vpop.eup %1272 }
 0x2db   :  { %v1275_v9 = vpop.eup %1274  ;;  %v288_v10 = vmul.f32 0.5, %v1273_v8 }
 0x2dc   :  { %v289_v13 = vmul.f32 %v1275_v9, %v1445_v15 }
 0x2dd   :  { %v290_v14 = vadd.f32 0.5, %v288_v10 }
 0x2de   :  { %v291_v17 = vadd.f32 %v289_v13, %v1456_v23 }
 0x2df   :  { %v296_v22 = vmul.f32 %v294_v21, %v290_v14 }
 0x2e0   :  { %v297_v19 = vmul.f32 %v291_v17, %v290_v14 }
 0x2e2   :  { %299 = vrot.lane.b32.xlu0 %v297_v19, %s1373_s2 }
 0x354   :  { %v300_v24 = vpop.permute.xlu0 %299 }
 0x355   :  { %v302_v25 = vadd.f32 %v300_v24, %v296_v22  ;;  %v1571_v22 = vadd.f32 %v1521_v28, %v1441_v11  ;;  %v1575_v24 = vadd.f32 %v1523_v29, %v1443_v12 }
 0x357   :  { %1276 = vtanh.f32 %v302_v25 }
 0x361   :  { %v1277_v26 = vpop.eup %1276 }
 0x362   :  { %v304_v27 = vmul.f32 %v1277_v26, %v291_v17 }
 0x364   :  { %306 = vrot.lane.b32.xlu1 %v304_v27, %s1373_s2 }
 0x3d6   :  { %v307_v30 = vpop.permute.xlu1 %306 }
 0x3d7   :  { %1096 = vmatmul.mubr.msk.f32.vlgmr.msra.gmra.mrb[4].mxu0 %vm209_vm4, %v307_v30 }
 0x3d8   :  { %1172 = vmatpush1.bf16.msra.mxu0 %v1463_v34  ;;  %568 = vmatprep.mubr.f32.mxu0 %v1371_v0 }
 0x3d9   :  { %1174 = vmatprep.subr.bf16.mxu0 %v1469_v37 }
 0x3dc   :  { %1176 = vmatpush1.bf16.msra.mxu0 %v1471_v40 }
 0x3dd   :  { %1178 = vmatprep.subr.bf16.mxu0 %v1474_v44 }
 0x3e0   :  { %1180 = vmatpush1.bf16.msra.mxu0 %v1478_v48 }
 0x3e1   :  { %1182 = vmatprep.subr.bf16.mxu0 %v1482_v49 }
 0x3e4   :  { %1184 = vmatpush1.bf16.msra.mxu0 %v1486_v52 }
 0x3e5   :  { %1202 = vmatprep.subr.bf16.mxu0 %v1461_v32 }
 0x4aa   :  { %v380_v33 = vpop.f32.mrb[4].mxu0 }
 0x4ab   :  { %v381_v36 = vadd.f32 %v380_v33, %v308_v31  ;;  %v382_v38 = vpop.f32.mrb[5].mxu0 }
 0x4ac   :  { %v383_v39 = vadd.f32 %v382_v38, %v309_v35 }
 0x4ad   :  { %v385_v41 = vmul.f32 0.5, %v381_v36 }
 0x4ae   :  { %v386_v42 = vmul.f32 %v383_v39, %v1445_v15 }
 0x4af   :  { %1278 = vtanh.f32 %v385_v41 }
 0x4b0   :  { %1280 = vtanh.f32 %v386_v42 }
 0x4b9   :  { %v1279_v43 = vpop.eup %1278 }
 0x4ba   :  { %v1281_v45 = vpop.eup %1280  ;;  %v389_v46 = vmul.f32 0.5, %v1279_v43 }
 0x4bb   :  { %v390_v47 = vmul.f32 %v1281_v45, %v1445_v15 }
 0x4bc   :  { %v391_v50 = vadd.f32 0.5, %v389_v46 }
 0x4bd   :  { %v392_v51 = vadd.f32 %v390_v47, %v1456_v23 }
 0x4be   :  { %v393_v54 = vmul.f32 %v391_v50, %v302_v25 }
 0x4bf   :  { %v394_v53 = vmul.f32 %v392_v51, %v391_v50  ;;  %v597_v50 = vrot.slane %v1571_v22, 2 }
 0x4c1   :  { %396 = vrot.lane.b32.xlu0 %v394_v53, %s1373_s2  ;;  %v598_v53 = vrot.slane %v1575_v24, 2 }
 0x533   :  { %v397_v55 = vpop.permute.xlu0 %396 }
 0x534   :  { %v399_v56 = vadd.f32 %v397_v55, %v393_v54 }
 0x536   :  { %1282 = vtanh.f32 %v399_v56 }
 0x540   :  { %v1283_v57 = vpop.eup %1282 }
 0x541   :  { %v401_v58 = vmul.f32 %v1283_v57, %v392_v51 }
 0x543   :  { %403 = vrot.lane.b32.xlu1 %v401_v58, %s1373_s2 }
 0x5b5   :  { %v404_v59 = vpop.permute.xlu1 %403 }
 0x5b6   :  { %1097 = vmatmul.mubr.msk.f32.vlgmr.msra.gmra.mrb[2].mxu1 %vm209_vm4, %v404_v59 }
 0x5b7   :  { %1188 = vmatpush1.bf16.msra.mxu1 %v1463_v34  ;;  %667 = vmatprep.mubr.f32.mxu1 %v1371_v0 }
 0x5b8   :  { %1190 = vmatprep.subr.bf16.mxu1 %v1469_v37 }
 0x5bb   :  { %1192 = vmatpush1.bf16.msra.mxu1 %v1471_v40 }
 0x5bc   :  { %1194 = vmatprep.subr.bf16.mxu1 %v1474_v44 }
 0x5bf   :  { %1196 = vmatpush1.bf16.msra.mxu1 %v1478_v48 }
 0x5c0   :  { %1198 = vmatprep.subr.bf16.mxu1 %v1482_v49 }
 0x5c3   :  { %1200 = vmatpush1.bf16.msra.mxu1 %v1486_v52 }
 0x5c4   :  { %1218 = vmatprep.subr.bf16.mxu1 %v1461_v32 }
 0x689   :  { %v477_v61 = vpop.f32.mrb[2].mxu1 }
 0x68a   :  { %v478_v63 = vadd.f32 %v477_v61, %v405_v60  ;;  %v479_v1 = vpop.f32.mrb[3].mxu1 }
 0x68b   :  { %v480_v2 = vadd.f32 %v479_v1, %v406_v62 }
 0x68c   :  { %v482_v3 = vmul.f32 0.5, %v478_v63 }
 0x68d   :  { %v483_v4 = vmul.f32 %v480_v2, %v1445_v15 }
 0x68e   :  { %1284 = vtanh.f32 %v482_v3 }
 0x68f   :  { %1286 = vtanh.f32 %v483_v4 }
 0x698   :  { %v1285_v5 = vpop.eup %1284 }
 0x699   :  { %v1287_v7 = vpop.eup %1286  ;;  %v486_v8 = vmul.f32 0.5, %v1285_v5 }
 0x69a   :  { %v487_v9 = vmul.f32 %v1287_v7, %v1445_v15 }
 0x69b   :  { %v488_v10 = vadd.f32 0.5, %v486_v8 }
 0x69c   :  { %v489_v13 = vadd.f32 %v487_v9, %v1456_v23 }
 0x69d   :  { %v490_v18 = vmul.f32 %v488_v10, %v399_v56 }
 0x69e   :  { %v491_v16 = vmul.f32 %v489_v13, %v488_v10  ;;  %v694_v10 = vrot.slane %v1571_v22, 4 }
 0x6a0   :  { %493 = vrot.lane.b32.xlu0 %v491_v16, %s1373_s2  ;;  %v695_v16 = vrot.slane %v1575_v24, 4 }
 0x712   :  { %v494_v14 = vpop.permute.xlu0 %493 }
 0x713   :  { %v496_v17 = vadd.f32 %v494_v14, %v490_v18 }
 0x715   :  { %1288 = vtanh.f32 %v496_v17 }
 0x71f   :  { %v1289_v19 = vpop.eup %1288 }
 0x720   :  { %v498_v20 = vmul.f32 %v1289_v19, %v489_v13 }
 0x722   :  { %500 = vrot.lane.b32.xlu1 %v498_v20, %s1373_s2 }
 0x794   :  { %v501_v21 = vpop.permute.xlu1 %500 }
 0x795   :  { %1098 = vmatmul.mubr.msk.f32.vlgmr.msra.gmra.mrb[6].mxu0 %vm209_vm4, %v501_v21 }
 0x796   :  { %1204 = vmatpush1.bf16.msra.mxu0 %v1463_v34  ;;  %764 = vmatprep.mubr.f32.mxu0 %v1371_v0 }
 0x797   :  { %1206 = vmatprep.subr.bf16.mxu0 %v1469_v37 }
 0x79a   :  { %1208 = vmatpush1.bf16.msra.mxu0 %v1471_v40 }
 0x79b   :  { %1210 = vmatprep.subr.bf16.mxu0 %v1474_v44 }
 0x79e   :  { %1212 = vmatpush1.bf16.msra.mxu0 %v1478_v48 }
 0x79f   :  { %1214 = vmatprep.subr.bf16.mxu0 %v1482_v49 }
 0x7a2   :  { %1216 = vmatpush1.bf16.msra.mxu0 %v1486_v52 }
 0x7a3   :  { %1234 = vmatprep.subr.bf16.mxu0 %v1461_v32 }
 0x868   :  { %v570_v25 = vpop.f32.mrb[6].mxu0 }
 0x869   :  { %v571_v26 = vadd.f32 %v570_v25, %v1571_v22  ;;  %v572_v27 = vpop.f32.mrb[7].mxu0 }
 0x86a   :  { %v573_v30 = vadd.f32 %v572_v27, %v1575_v24 }
 0x86b   :  { %v575_v31 = vmul.f32 0.5, %v571_v26 }
 0x86c   :  { %v576_v33 = vmul.f32 %v573_v30, %v1445_v15 }
 0x86d   :  { %1290 = vtanh.f32 %v575_v31 }
 0x86e   :  { %1292 = vtanh.f32 %v576_v33  ;;  %v791_v33 = vrot.slane %v1571_v22, 6 }
 0x877   :  { %v1291_v32 = vpop.eup %1290 }
 0x878   :  { %v1293_v35 = vpop.eup %1292  ;;  %v579_v36 = vmul.f32 0.5, %v1291_v32 }
 0x879   :  { %v580_v28 = vmul.f32 %v1293_v35, %v1445_v15  ;;  %v792_v35 = vrot.slane %v1575_v24, 6 }
 0x87a   :  { %v581_v38 = vadd.f32 0.5, %v579_v36 }
 0x87b   :  { %v582_v29 = vadd.f32 %v580_v28, %v1456_v23 }
 0x87c   :  { %v583_v41 = vmul.f32 %v581_v38, %v496_v17 }
 0x87d   :  { %v584_v39 = vmul.f32 %v582_v29, %v581_v38 }
 0x87f   :  { %586 = vrot.lane.b32.xlu0 %v584_v39, %s1373_s2 }
 0x8f1   :  { %v587_v42 = vpop.permute.xlu0 %586 }
 0x8f2   :  { %v589_v43 = vadd.f32 %v587_v42, %v583_v41 }
 0x8f4   :  { %1294 = vtanh.f32 %v589_v43 }
 0x8fe   :  { %v1295_v45 = vpop.eup %1294 }
 0x8ff   :  { %v591_v46 = vmul.f32 %v1295_v45, %v582_v29 }
 0x901   :  { %593 = vrot.lane.b32.xlu1 %v591_v46, %s1373_s2 }
 0x973   :  { %v594_v47 = vpop.permute.xlu1 %593 }
 0x974   :  { %1099 = vmatmul.mubr.msk.f32.vlgmr.msra.gmra.mrb[4].mxu1 %vm209_vm4, %v594_v47 }
 0x975   :  { %1220 = vmatpush1.bf16.msra.mxu1 %v1463_v34  ;;  %861 = vmatprep.mubr.f32.mxu1 %v1371_v0 }
 0x976   :  { %1222 = vmatprep.subr.bf16.mxu1 %v1469_v37 }
 0x979   :  { %1224 = vmatpush1.bf16.msra.mxu1 %v1471_v40 }
 0x97a   :  { %1226 = vmatprep.subr.bf16.mxu1 %v1474_v44 }
 0x97d   :  { %1228 = vmatpush1.bf16.msra.mxu1 %v1478_v48 }
 0x97e   :  { %1230 = vmatprep.subr.bf16.mxu1 %v1482_v49 }
 0x981   :  { %1232 = vmatpush1.bf16.msra.mxu1 %v1486_v52 }
 0xa47   :  { %v669_v51 = vpop.f32.mrb[4].mxu1 }
 0xa48   :  { %v670_v54 = vadd.f32 %v669_v51, %v597_v50  ;;  %v671_v55 = vpop.f32.mrb[5].mxu1 }
 0xa49   :  { %v672_v56 = vadd.f32 %v671_v55, %v598_v53 }
 0xa4a   :  { %v674_v57 = vmul.f32 0.5, %v670_v54 }
 0xa4b   :  { %v675_v58 = vmul.f32 %v672_v56, %v1445_v15 }
 0xa4c   :  { %1296 = vtanh.f32 %v674_v57 }
 0xa4d   :  { %1298 = vtanh.f32 %v675_v58 }
 0xa56   :  { %v1297_v59 = vpop.eup %1296 }
 0xa57   :  { %v1299_v60 = vpop.eup %1298  ;;  %v678_v61 = vmul.f32 0.5, %v1297_v59 }
 0xa58   :  { %v679_v62 = vmul.f32 %v1299_v60, %v1445_v15 }
 0xa59   :  { %v680_v63 = vadd.f32 0.5, %v678_v61 }
 0xa5a   :  { %v681_v1 = vadd.f32 %v679_v62, %v1456_v23 }
 0xa5b   :  { %v682_v3 = vmul.f32 %v680_v63, %v589_v43 }
 0xa5c   :  { %v683_v2 = vmul.f32 %v681_v1, %v680_v63 }
 0xa5e   :  { %685 = vrot.lane.b32.xlu0 %v683_v2, %s1373_s2 }
 0xad0   :  { %v686_v4 = vpop.permute.xlu0 %685 }
 0xad1   :  { %v688_v5 = vadd.f32 %v686_v4, %v682_v3 }
 0xad3   :  { %1300 = vtanh.f32 %v688_v5 }
 0xadd   :  { %v1301_v7 = vpop.eup %1300 }
 0xade   :  { %v690_v8 = vmul.f32 %v1301_v7, %v681_v1 }
 0xae0   :  { %692 = vrot.lane.b32.xlu1 %v690_v8, %s1373_s2 }
 0xb52   :  { %v693_v9 = vpop.permute.xlu1 %692 }
 0xb53   :  { %1100 = vmatmul.mubr.msk.f32.vlgmr.msra.gmra.mrb[8].mxu0 %vm209_vm4, %v693_v9  ;;  %v988_v9 = vld [vmem:[%s1666_s4 + $0x8] sm:$0xff] }
 0xb54   :  { %1236 = vmatpush1.bf16.msra.mxu0 %v1463_v34  ;;  %954 = vmatprep.mubr.f32.mxu0 %v1371_v0 }
 0xb55   :  { %1238 = vmatprep.subr.bf16.mxu0 %v1469_v37 }
 0xb58   :  { %1240 = vmatpush1.bf16.msra.mxu0 %v1471_v40 }
 0xb59   :  { %1242 = vmatprep.subr.bf16.mxu0 %v1474_v44 }
 0xb5c   :  { %1244 = vmatpush1.bf16.msra.mxu0 %v1478_v48 }
 0xb5d   :  { %1246 = vmatprep.subr.bf16.mxu0 %v1482_v49 }
 0xb60   :  { %1248 = vmatpush1.bf16.msra.mxu0 %v1486_v52 }
 0xc26   :  { %v766_v13 = vpop.f32.mrb[8].mxu0 }
 0xc27   :  { %v767_v34 = vadd.f32 %v766_v13, %v694_v10  ;;  %v768_v18 = vpop.f32.mrb[9].mxu0  ;;  %v990_v13 = vld [vmem:[%s1666_s4 + $0x18] sm:$0xff] }
 0xc28   :  { %v769_v14 = vadd.f32 %v768_v18, %v695_v16 }
 0xc29   :  { %v771_v17 = vmul.f32 0.5, %v767_v34 }
 0xc2a   :  { %v772_v37 = vmul.f32 %v769_v14, %v1445_v15 }
 0xc2b   :  { %1302 = vtanh.f32 %v771_v17 }
 0xc2c   :  { %1304 = vtanh.f32 %v772_v37 }
 0xc35   :  { %v1303_v40 = vpop.eup %1302 }
 0xc36   :  { %v1305_v44 = vpop.eup %1304  ;;  %v775_v48 = vmul.f32 0.5, %v1303_v40 }
 0xc37   :  { %v776_v49 = vmul.f32 %v1305_v44, %v1445_v15 }
 0xc38   :  { %v777_v19 = vadd.f32 0.5, %v775_v48 }
 0xc39   :  { %v778_v52 = vadd.f32 %v776_v49, %v1456_v23 }
 0xc3a   :  { %v779_v21 = vmul.f32 %v777_v19, %v688_v5 }
 0xc3b   :  { %v780_v20 = vmul.f32 %v778_v52, %v777_v19 }
 0xc3d   :  { %782 = vrot.lane.b32.xlu0 %v780_v20, %s1373_s2 }
 0xcaf   :  { %v783_v25 = vpop.permute.xlu0 %782 }
 0xcb0   :  { %v785_v26 = vadd.f32 %v783_v25, %v779_v21 }
 0xcb2   :  { %1306 = vtanh.f32 %v785_v26 }
 0xcbc   :  { %v1307_v27 = vpop.eup %1306 }
 0xcbd   :  { %v787_v30 = vmul.f32 %v1307_v27, %v778_v52 }
 0xcbf   :  { %789 = vrot.lane.b32.xlu1 %v787_v30, %s1373_s2 }
 0xd31   :  { %v790_v31 = vpop.permute.xlu1 %789 }
 0xd32   :  { %1101 = vmatmul.mubr.msk.f32.vlgmr.msra.gmra.mrb[6].mxu1 %vm209_vm4, %v790_v31 }
 0xd33   :  { %1118 = vmatprep.mubr.msk.f32.mxu1 %vm1375_vm5, %v1371_v0  ;;  %v1103_v0 = vld [vmem:[%s1667_s5] ss:$0 sm:$0xff] }
 0xe05   :  { %v863_v32 = vpop.f32.mrb[6].mxu1 }
 0xe06   :  { %v864_v36 = vadd.f32 %v863_v32, %v791_v33  ;;  %v865_v28 = vpop.f32.mrb[7].mxu1 }
 0xe07   :  { %v866_v38 = vadd.f32 %v865_v28, %v792_v35 }
 0xe08   :  { %v868_v29 = vmul.f32 0.5, %v864_v36 }
 0xe09   :  { %v869_v39 = vmul.f32 %v866_v38, %v1445_v15 }
 0xe0a   :  { %1308 = vtanh.f32 %v868_v29 }
 0xe0b   :  { %1310 = vtanh.f32 %v869_v39 }
 0xe14   :  { %v1309_v41 = vpop.eup %1308 }
 0xe15   :  { %v1311_v42 = vpop.eup %1310  ;;  %v872_v43 = vmul.f32 0.5, %v1309_v41 }
 0xe16   :  { %v873_v45 = vmul.f32 %v1311_v42, %v1445_v15 }
 0xe17   :  { %v874_v46 = vadd.f32 0.5, %v872_v43 }
 0xe18   :  { %v875_v47 = vadd.f32 %v873_v45, %v1456_v23 }
 0xe19   :  { %v876_v24 = vmul.f32 %v874_v46, %v785_v26 }
 0xe1a   :  { %v877_v22 = vmul.f32 %v875_v47, %v874_v46 }
 0xe1c   :  { %879 = vrot.lane.b32.xlu0 %v877_v22, %s1373_s2 }
 0xe8e   :  { %v880_v50 = vpop.permute.xlu0 %879 }
 0xe8f   :  { %v882_v51 = vadd.f32 %v880_v50, %v876_v24 }
 0xe91   :  { %1312 = vtanh.f32 %v882_v51 }
 0xe9b   :  { %v1313_v53 = vpop.eup %1312 }
 0xe9c   :  { %v884_v54 = vmul.f32 %v1313_v53, %v875_v47 }
 0xe9e   :  { %886 = vrot.lane.b32.xlu1 %v884_v54, %s1373_s2 }
 0xf10   :  { %v887_v55 = vpop.permute.xlu1 %886 }
 0xf11   :  { %1102 = vmatmul.mubr.msk.f32.vlgmr.msra.gmra.mrb[10].mxu0 %vm209_vm4, %v887_v55 }
 0xfe4   :  { %v956_v56 = vpop.f32.mrb[10].mxu0 }
 0xfe5   :  { %v957_v57 = vadd.f32 %v956_v56, %v1441_v11  ;;  %v958_v58 = vpop.f32.mrb[11].mxu0 }
 0xfe6   :  { %v959_v59 = vadd.f32 %v958_v58, %v1443_v12  ;;  %v987_v12 = vld [vmem:[%s1666_s4] sm:$0xff] }
 0xfe7   :  { %v961_v60 = vmul.f32 0.5, %v957_v57  ;;  %v1250_v10 = vpack.c.bf16 %v988_v9, %v987_v12 }
 0xfe8   :  { %v962_v61 = vmul.f32 %v959_v59, %v1445_v15 }
 0xfe9   :  { %1314 = vtanh.f32 %v961_v60 }
 0xfea   :  { %1316 = vtanh.f32 %v962_v61 }
 0xff3   :  { %v1315_v62 = vpop.eup %1314 }
 0xff4   :  { %v1317_v63 = vpop.eup %1316  ;;  %v965_v1 = vmul.f32 0.5, %v1315_v62 }
 0xff5   :  { %v966_v2 = vmul.f32 %v1317_v63, %v1445_v15  ;;  %v989_v15 = vld [vmem:[%s1666_s4 + $0x10] sm:$0xff] }
 0xff6   :  { %v967_v3 = vadd.f32 0.5, %v965_v1  ;;  %v1253_v16 = vpack.c.bf16 %v990_v13, %v989_v15 }
 0xff7   :  { %v968_v4 = vadd.f32 %v966_v2, %v1456_v23  ;;  %v1374_v23 = vmov 0.0|0.0  }
 0xff8   :  { %v969_v11 = vmul.f32 %v967_v3, %v882_v51  ;;  %1249 = vmatprep.subr.bf16.mxu1 %v1374_v23 }
 0xff9   :  { %v970_v5 = vmul.f32 %v968_v4, %v967_v3  ;;  %1251 = vmatpush3.bf16.msra.mxu1 %v1250_v10 }
 0xffa   :  { %1252 = vmatprep.subr.bf16.mxu1 %v1374_v23 }
 0xffb   :  { %972 = vrot.lane.b32.xlu0 %v970_v5, %s1373_s2 }
 0xffd   :  { %1254 = vmatpush3.bf16.msra.mxu1 %v1253_v16 }
0x106d   :  { %v973_v7 = vpop.permute.xlu0 %972 }
0x106e   :  { %v975_v8 = vadd.f32 %v973_v7, %v969_v11 }
0x1070   :  { %1318 = vtanh.f32 %v975_v8 }
0x107a   :  { %v1319_v34 = vpop.eup %1318 }
0x107b   :  { %v977_v18 = vmul.f32 %v1319_v34, %v968_v4 }
0x107d   :  { %982 = vrot.lane.b32.xlu1 %v977_v18, %s1373_s2 }
0x10ef   :  { %v983_v14 = vpop.permute.xlu1 %982 }
0x10f0   :  { %v986_v17 = vsel %vm980_vm8, %v983_v14, %v887_v55 }
0x10f1   :  { %999 = vrot.lane.b32.xlu0 %v986_v17, %s1376_s24 }
0x1163   :  { %v1000_v37 = vpop.permute.xlu0 %999 }
0x1164   :  { %1119 = vmatmul.mubr.msk.f32.vlgmr.msra.gmra.mrb[8].mxu1 %vm1001_vm9, %v1000_v37 }
0x1237   :  { %v1070_v40 = vpop.f32.mrb[8].mxu1 }
0x1238   :  { %v1071_v44 = vadd.f32 %v1103_v0, %v1070_v40  ;;  %v1120_v48 = vpop.f32.mrb[9].mxu1 }
0x123a   :  { %1075 = vst.msk [vmem:[#allocation5] sm:$0x3] %vm1074_vm10, %v1071_v44 }
0x123b   :  { %1353 = shalt.err (!%p1350_p12)
}
0x123c   :  { %s1354_s7 = scalar_lea.hbm %s1668_s6, 32 }
0x123d   :  { %p1355_p13 = scmp.ne.s32.totalorder %s1668_s6, %s1354_s7  ;;  %p1358_p0 = scmp.lt.u32.totalorder %s1354_s7, %s1668_s6 }
0x123f   :  { %p1360_p1 = pnand %p1358_p0, %p1355_p13 }
0x1241   :  { %1363 = shalt.err (!%p1360_p1)
}
0x1242   :  { %1085 = dma.vmem_to_hbm [thread:$0]  %s1083_s27, 32, %s1668_s6, [#allocation4]  }
0x1243   :  { %1366 = dma.done.wait [#allocation4], 32  }
0x1244   :  { %1367 = vsyncadd [#allocation4], 4294967264 }
0x1245   :  { %1089 = vsyncpa [#allocation3], 1 }
0x1246   :  { %1090 = vsyncpa [#allocation4], 1 }

</bundles_post_ra>
